<compile_context>
chip_gen: v5e
topology: v5e:2x2
jax: 0.10.0
libtpu: 0.0.40
codegen_flags: <defaults>
</compile_context>

<pallas_src>
import functools

import jax
import jax.numpy as jnp
from jax.experimental import pallas as pl
from jax.experimental.pallas import tpu as pltpu


def _round_up(x, m):
    return ((x + m - 1) // m) * m


def _gated_mlp_kernel(z_ref, w1_ref, w2_ref, w3_ref, o_ref, acc_ref, *,
                      approx_sigmoid):
    f = pl.program_id(1)

    @pl.when(f == 0)
    def _():
        acc_ref[...] = jnp.zeros_like(acc_ref)

    z = z_ref[...]                                                     # (tm, H)

    # Up projections on the MXU, f32 accumulation.
    h1 = jnp.dot(z, w1_ref[...], preferred_element_type=jnp.float32)  # (tm, tf)
    h2 = jnp.dot(z, w2_ref[...], preferred_element_type=jnp.float32)  # (tm, tf)

    # SiLU(h1) * h2, fused so h1/h2 die immediately (vreg-pressure hygiene).
    if approx_sigmoid:
        # exp -> EUP, approx reciprocal -> EUP: keeps the VALU slot free.
        sig = pl.reciprocal(1.0 + jnp.exp(-h1), approx=True)
    else:
        sig = jax.nn.sigmoid(h1)
    gated = h2 * (h1 * sig)                                            # (tm, tf)

    # Partial down projection for this F tile; accumulate in f32 VMEM scratch.
    acc_ref[...] += jnp.dot(gated.astype(w3_ref.dtype), w3_ref[...],
                            preferred_element_type=jnp.float32)        # (tm, H)

    @pl.when(f == pl.num_programs(1) - 1)
    def _():
        o_ref[...] = acc_ref[...].astype(o_ref.dtype)


def parallel_gated_mlp(z, w1, w2, w3, *, block_m=256, block_f=None,
                       approx_sigmoid=False):
    """z: (B, S, H) or (M, H). Weights in (in, out) layout as described above."""
    orig_shape = z.shape
    H = orig_shape[-1]
    z2d = z.reshape(-1, H)
    M = z2d.shape[0]
    Hw, F = w1.shape
    assert Hw == H and w2.shape == (H, F) and w3.shape == (F, H)

    # ----- M tiling: real tile size, pad rows to a multiple of it. -----------
    tm = _round_up(min(block_m, _round_up(M, 8)), 8)
    M_pad = _round_up(M, tm)
    if M_pad != M:
        z2d = jnp.pad(z2d, ((0, M_pad - M), (0, 0)))

    # ----- F tiling: largest preferred tile that divides F, else full F. -----
    if block_f is None:
        for cand in (512, 256, 128):
            if F % cand == 0:
                block_f = cand
                break
        else:
            block_f = F
    assert F % block_f == 0
    tf = block_f

    grid = (M_pad // tm, F // tf)

    # ----- VMEM budget from tile arithmetic (double-buffered inputs/outputs).
    in_bytes = z2d.dtype.itemsize
    w_bytes = max(w1.dtype.itemsize, w2.dtype.itemsize, w3.dtype.itemsize)
    per_step_vmem = (
        2 * tm * H * in_bytes            # z tile        (double-buffered)
        + 2 * (2 * H * tf) * w_bytes     # w1 + w2 tiles (double-buffered)
        + 2 * (tf * H) * w_bytes         # w3 tile       (double-buffered)
        + 2 * tm * H * in_bytes          # output tile   (double-buffered)
        + tm * H * 4                     # f32 accumulator scratch
    )
    # Floor 32 MiB (compiler scratch headroom), cap 64 MiB (v7x-safe).
    vmem_limit = int(min(64 * 2**20, max(32 * 2**20, 2 * per_step_vmem)))

    cost = pl.CostEstimate(
        flops=6 * M_pad * H * F,                       # 2 up-proj + 1 down-proj
        transcendentals=M_pad * F,                     # one exp per h1 element
        bytes_accessed=(M_pad * H * in_bytes * 2
                        + grid[0] * (2 * H * F + F * H) * w_bytes),
    )

    kernel = functools.partial(_gated_mlp_kernel, approx_sigmoid=approx_sigmoid)

    out = pl.pallas_call(
        kernel,
        out_shape=jax.ShapeDtypeStruct((M_pad, H), z.dtype),
        grid_spec=pltpu.PrefetchScalarGridSpec(
            num_scalar_prefetch=0,
            grid=grid,
            in_specs=[
                pl.BlockSpec((tm, H), lambda i, f: (i, 0)),   # z tile
                pl.BlockSpec((H, tf), lambda i, f: (0, f)),   # w1 tile
                pl.BlockSpec((H, tf), lambda i, f: (0, f)),   # w2 tile
                pl.BlockSpec((tf, H), lambda i, f: (f, 0)),   # w3 tile
            ],
            out_specs=pl.BlockSpec((tm, H), lambda i, f: (i, 0)),
            scratch_shapes=[pltpu.VMEM((tm, H), jnp.float32)],
        ),
        compiler_params=pltpu.CompilerParams(
            dimension_semantics=("parallel", "arbitrary"),
            vmem_limit_bytes=vmem_limit,
        ),
        cost_estimate=cost,
    )(z2d, w1, w2, w3)

    return out[:M].reshape(orig_shape)


def _inner_size(hidden_size, multiple_of=64, model_parallel_size=1):
    m = multiple_of * model_parallel_size
    inner = int(2 * hidden_size * 4 / 3)
    return m * ((inner + m - 1) // m)


def _reference(z, w1, w2, w3):
    z2d = z.reshape(-1, z.shape[-1])
    h1 = z2d @ w1
    h2 = z2d @ w2
    return (((h1 * jax.nn.sigmoid(h1)) * h2) @ w3).reshape(z.shape)


if __name__ == "__main__":
    key = jax.random.PRNGKey(0)
    scale = 0.02

    # ---- Test 1: module-consistent small shapes (hidden=32 -> inner=128). ---
    batch, seq, hidden = 2, 8, 32
    inner = _inner_size(hidden)  # 128
    kz, k1, k2, k3, key = jax.random.split(key, 5)
    z = jax.random.normal(kz, (batch, seq, hidden), dtype=jnp.float32)
    w1 = scale * jax.random.normal(k1, (hidden, inner), dtype=jnp.float32)
    w2 = scale * jax.random.normal(k2, (hidden, inner), dtype=jnp.float32)
    w3 = scale * jax.random.normal(k3, (inner, hidden), dtype=jnp.float32)

    y = jax.block_until_ready(parallel_gated_mlp(z, w1, w2, w3))
    ref = _reference(z, w1, w2, w3)
    assert y.shape == (batch, seq, hidden)
    assert jnp.allclose(y, ref, atol=1e-5, rtol=1e-5), "test1 mismatch vs reference"

    # ---- Test 2: exercises the multi-step grid (3 M tiles with row padding,
    #      3 F tiles accumulating into the f32 VMEM scratch). ------------------
    batch, seq, hidden = 2, 9, 128          # M = 18 -> padded to 24 with tm=8
    inner = _inner_size(hidden)             # 384 -> 3 F tiles of 128
    kz, k1, k2, k3, key = jax.random.split(key, 5)
    z = jax.random.normal(kz, (batch, seq, hidden), dtype=jnp.float32)
    w1 = scale * jax.random.normal(k1, (hidden, inner), dtype=jnp.float32)
    w2 = scale * jax.random.normal(k2, (hidden, inner), dtype=jnp.float32)
    w3 = scale * jax.random.normal(k3, (inner, hidden), dtype=jnp.float32)

    y = jax.block_until_ready(parallel_gated_mlp(z, w1, w2, w3, block_m=8))
    ref = _reference(z, w1, w2, w3)
    assert y.shape == (batch, seq, hidden)
    assert jnp.allclose(y, ref, atol=1e-4, rtol=1e-3), "test2 mismatch vs reference"

    print("KERNEL_OK")
</pallas_src>

<mosaic_0001>
module attributes {stable_mosaic.version = 11 : i64} {
  func.func @_gated_mlp_kernel(%arg0: i32, %arg1: i32, %arg2: memref<16x32xf32, #tpu.memory_space<vmem>>, %arg3: memref<32x128xf32, #tpu.memory_space<vmem>>, %arg4: memref<32x128xf32, #tpu.memory_space<vmem>>, %arg5: memref<128x32xf32, #tpu.memory_space<vmem>>, %arg6: memref<16x32xf32, #tpu.memory_space<vmem>>, %arg7: memref<16x32xf32, #tpu.memory_space<vmem>>) attributes {dimension_semantics = [#tpu.dimension_semantics<parallel>, #tpu.dimension_semantics<arbitrary>], iteration_bounds = array<i64: 1, 1>, scalar_prefetch = 0 : i64, scratch_operands = 1 : i64, tpu.core_type = #tpu.core_type<tc>, window_params = [{transform_indices = @transform_0, window_bounds = array<i64: 16, 32>}, {transform_indices = @transform_1, window_bounds = array<i64: 32, 128>}, {transform_indices = @transform_2, window_bounds = array<i64: 32, 128>}, {transform_indices = @transform_3, window_bounds = array<i64: 128, 32>}, {transform_indices = @transform_4, window_bounds = array<i64: 16, 32>}]} {
    %c0_i32 = arith.constant 0 : i32
    %0 = arith.cmpi eq, %arg1, %c0_i32 : i32
    %1 = arith.extui %0 : i1 to i32
    %c0_i32_0 = arith.constant 0 : i32
    %2 = arith.cmpi ne, %1, %c0_i32_0 : i32
    scf.if %2 {
      %cst_17 = arith.constant 0.000000e+00 : f32
      %23 = vector.broadcast %cst_17 : f32 to vector<16x32xf32>
      %c0_18 = arith.constant 0 : index
      %c0_19 = arith.constant 0 : index
      %24 = vector.load %arg7[%c0_18, %c0_19] : memref<16x32xf32, #tpu.memory_space<vmem>>, vector<16x32xf32>
      tpu.vector_store %arg7[%c0_18, %c0_19], %23 {strides = array<i32>} : memref<16x32xf32, #tpu.memory_space<vmem>>, vector<16x32xf32>,
    } else {
    }
    %c0 = arith.constant 0 : index
    %c0_1 = arith.constant 0 : index
    %3 = vector.load %arg2[%c0, %c0_1] : memref<16x32xf32, #tpu.memory_space<vmem>>, vector<16x32xf32>
    %c0_2 = arith.constant 0 : index
    %c0_3 = arith.constant 0 : index
    %4 = vector.load %arg3[%c0_2, %c0_3] : memref<32x128xf32, #tpu.memory_space<vmem>>, vector<32x128xf32>
    %cst = arith.constant dense<0.000000e+00> : vector<16x128xf32>
    %5 = tpu.matmul %3, %4, %cst {dimension_numbers = #tpu.dot_dimension_numbers<[1], [0], [0], [1], [0, 0, 1, 1], [], []>} : vector<16x32xf32>, vector<32x128xf32>, vector<16x128xf32> -> vector<16x128xf32>
    %c0_4 = arith.constant 0 : index
    %c0_5 = arith.constant 0 : index
    %6 = vector.load %arg4[%c0_4, %c0_5] : memref<32x128xf32, #tpu.memory_space<vmem>>, vector<32x128xf32>
    %cst_6 = arith.constant dense<0.000000e+00> : vector<16x128xf32>
    %7 = tpu.matmul %3, %6, %cst_6 {dimension_numbers = #tpu.dot_dimension_numbers<[1], [0], [0], [1], [0, 0, 1, 1], [], []>} : vector<16x32xf32>, vector<32x128xf32>, vector<16x128xf32> -> vector<16x128xf32>
    %8 = arith.negf %5 : vector<16x128xf32>
    %9 = math.exp %8 : vector<16x128xf32>
    %cst_7 = arith.constant 1.000000e+00 : f32
    %10 = vector.broadcast %cst_7 : f32 to vector<16x128xf32>
    %11 = arith.addf %10, %9 : vector<16x128xf32>
    %12 = arith.divf %10, %11 : vector<16x128xf32>
    %13 = arith.mulf %5, %12 : vector<16x128xf32>
    %14 = arith.mulf %7, %13 : vector<16x128xf32>
    %c0_8 = arith.constant 0 : index
    %c0_9 = arith.constant 0 : index
    %15 = vector.load %arg7[%c0_8, %c0_9] : memref<16x32xf32, #tpu.memory_space<vmem>>, vector<16x32xf32>
    %c0_10 = arith.constant 0 : index
    %c0_11 = arith.constant 0 : index
    %16 = vector.load %arg5[%c0_10, %c0_11] : memref<128x32xf32, #tpu.memory_space<vmem>>, vector<128x32xf32>
    %cst_12 = arith.constant dense<0.000000e+00> : vector<16x32xf32>
    %17 = tpu.matmul %14, %16, %cst_12 {dimension_numbers = #tpu.dot_dimension_numbers<[1], [0], [0], [1], [0, 0, 1, 1], [], []>} : vector<16x128xf32>, vector<128x32xf32>, vector<16x32xf32> -> vector<16x32xf32>
    %18 = arith.addf %15, %17 : vector<16x32xf32>
    %c0_13 = arith.constant 0 : index
    %c0_14 = arith.constant 0 : index
    %19 = vector.load %arg7[%c0_13, %c0_14] : memref<16x32xf32, #tpu.memory_space<vmem>>, vector<16x32xf32>
    tpu.vector_store %arg7[%c0_13, %c0_14], %18 {strides = array<i32>} : memref<16x32xf32, #tpu.memory_space<vmem>>, vector<16x32xf32>,
    %c0_i32_15 = arith.constant 0 : i32
    %20 = arith.cmpi eq, %arg1, %c0_i32_15 : i32
    %21 = arith.extui %20 : i1 to i32
    %c0_i32_16 = arith.constant 0 : i32
    %22 = arith.cmpi ne, %21, %c0_i32_16 : i32
    scf.if %22 {
      %c0_17 = arith.constant 0 : index
      %c0_18 = arith.constant 0 : index
      %23 = vector.load %arg7[%c0_17, %c0_18] : memref<16x32xf32, #tpu.memory_space<vmem>>, vector<16x32xf32>
      %c0_19 = arith.constant 0 : index
      %c0_20 = arith.constant 0 : index
      %24 = vector.load %arg6[%c0_19, %c0_20] : memref<16x32xf32, #tpu.memory_space<vmem>>, vector<16x32xf32>
      tpu.vector_store %arg6[%c0_19, %c0_20], %23 {strides = array<i32>} : memref<16x32xf32, #tpu.memory_space<vmem>>, vector<16x32xf32>,
    } else {
    }
    return
  }
  func.func @transform_0(%arg0: i32, %arg1: i32) -> (i32, i32) {
    %c0_i32 = arith.constant 0 : i32
    %c0_i32_0 = arith.constant 0 : i32
    return %arg0, %c0_i32 : i32, i32
  }
  func.func @transform_1(%arg0: i32, %arg1: i32) -> (i32, i32) {
    %c0_i32 = arith.constant 0 : i32
    %c0_i32_0 = arith.constant 0 : i32
    return %c0_i32, %arg1 : i32, i32
  }
  func.func @transform_2(%arg0: i32, %arg1: i32) -> (i32, i32) {
    %c0_i32 = arith.constant 0 : i32
    %c0_i32_0 = arith.constant 0 : i32
    return %c0_i32, %arg1 : i32, i32
  }
  func.func @transform_3(%arg0: i32, %arg1: i32) -> (i32, i32) {
    %c0_i32 = arith.constant 0 : i32
    %c0_i32_0 = arith.constant 0 : i32
    return %arg1, %c0_i32 : i32, i32
  }
  func.func @transform_4(%arg0: i32, %arg1: i32) -> (i32, i32) {
    %c0_i32 = arith.constant 0 : i32
    %c0_i32_0 = arith.constant 0 : i32
    return %arg0, %c0_i32 : i32, i32
  }
}

</mosaic_0001>

<bundles_post_ra>
// kernel: tpu_custom_call.1
= control target key start
LH: loop header
LB: loop body
LE: loop exit
PB: predicated region body
PF: predicated region fallthrough
CT: control target
= control target key end

     0   :  { %s380_s0 = inlined_call_operand.vmem [shape: f32[16,32], index: 0, kind: input, shape index: {}]   ;;  %s381_s1 = inlined_call_operand.vmem [shape: f32[32,128], index: 1, kind: input, shape index: {}]   ;;  %s382_s2 = inlined_call_operand.vmem [shape: f32[32,128], index: 2, kind: input, shape index: {}]   ;;  %s383_s3 = inlined_call_operand.vmem [shape: f32[128,32], index: 3, kind: input, shape index: {}]   ;;  %s384_s4 = inlined_call_operand.hbm [shape: f32[16,32], index: 4, kind: output, shape index: {}]  }
   0x1   :  { %v30_v0 = vld [vmem:[%s381_s1 + $0x18] sm:$0xff]  ;;  %v29_v1 = vld [vmem:[%s381_s1 + $0x10] sm:$0xff]  ;;  %v28_v2 = vld [vmem:[%s381_s1 + $0x8] sm:$0xff] }
   0x2   :  { %50 = vmatpush.msra.mxu0 %v30_v0  ;;  %v64_v3 = vld [vmem:[%s382_s2 + $0x18] sm:$0xff]  ;;  %v63_v4 = vld [vmem:[%s382_s2 + $0x10] sm:$0xff] }
   0x3   :  { %77 = vmatpush.msra.mxu1 %v64_v3 }
   0x4   :  { %51 = vmatpush.msra.mxu0 %v29_v1 }
   0x5   :  { %9 = vsyncpa [#allocation4], 0  ;;  %v27_v5 = vld [vmem:[%s381_s1] sm:$0xff]  ;;  %v62_v6 = vld [vmem:[%s382_s2 + $0x8] sm:$0xff]  ;;  %vm22_vm0 = vcmask 261120   ;;  %78 = vmatpush.msra.mxu1 %v63_v4  ;;  %v260_v32 = vmov 0.0  }
   0x6   :  { %52 = vmatpush.msra.mxu0 %v28_v2  ;;  %v25_v7 = vld [vmem:[%s380_s0] sm:$0xff]  ;;  %v26_v9 = vld [vmem:[%s380_s0 + $0x8] sm:$0xff]  ;;  %v147_v10 = vld [vmem:[%s383_s3 + $0x78] sm:$0xff]  ;;  %23 = vst.msk [vmem:[#allocation2] sm:$0xff] %vm22_vm0, %v260_v32  ;;  %s188_s0 = sshll.u32 %s384_s4, 4  ;;  %s262_s13 = smov 128   ;;  %s189_s0 = int_to_ptr.hbm [resolvable:$true] %s188_s0 }
   0x7   :  { %v61_v8 = vld [vmem:[%s382_s2] sm:$0xff]  ;;  %79 = vmatpush.msra.mxu1 %v62_v6  ;;  %148 = vmatpush.msra.mxu2 %v147_v10  ;;  %v146_v11 = vld [vmem:[%s383_s3 + $0x70] sm:$0xff]  ;;  %v145_v12 = vld [vmem:[%s383_s3 + $0x68] sm:$0xff]  ;;  %24 = vst.msk [vmem:[#allocation2 + $0x8] sm:$0xff] %vm22_vm0, %v260_v32  ;;  %s263_s14 = smov 8  }
   0x8   :  { %53 = vmatpush.msra.mxu0 %v27_v5  ;;  %206 = vmatpush.msra.mxu3 %v147_v10  ;;  %v144_v13 = vld [vmem:[%s383_s3 + $0x60] sm:$0xff]  ;;  %v143_v14 = vld [vmem:[%s383_s3 + $0x58] sm:$0xff]  ;;  %v142_v15 = vld [vmem:[%s383_s3 + $0x50] sm:$0xff] }
   0x9   :  { %200 = vmatmul.msk.f32.vlgmr.msra.gmra.mxu0 %vm22_vm0, %v25_v7  ;;  %80 = vmatpush.msra.mxu1 %v61_v8  ;;  %v141_v16 = vld [vmem:[%s383_s3 + $0x48] sm:$0xff]  ;;  %v140_v17 = vld [vmem:[%s383_s3 + $0x40] sm:$0xff]  ;;  %v139_v18 = vld [vmem:[%s383_s3 + $0x38] sm:$0xff] }
   0xa   :  { %202 = vmatmul.msk.f32.vlgmr.msra.gmra.mxu1 %vm22_vm0, %v25_v7  ;;  %149 = vmatpush.msra.mxu2 %v146_v11  ;;  %v138_v19 = vld [vmem:[%s383_s3 + $0x30] sm:$0xff]  ;;  %v137_v20 = vld [vmem:[%s383_s3 + $0x28] sm:$0xff]  ;;  %v136_v21 = vld [vmem:[%s383_s3 + $0x20] sm:$0xff] }
   0xb   :  { %207 = vmatpush.msra.mxu3 %v146_v11  ;;  %v135_v22 = vld [vmem:[%s383_s3 + $0x18] sm:$0xff]  ;;  %v134_v23 = vld [vmem:[%s383_s3 + $0x10] sm:$0xff]  ;;  %v133_v24 = vld [vmem:[%s383_s3 + $0x8] sm:$0xff] }
   0xc   :  { %150 = vmatpush.msra.mxu2 %v145_v12  ;;  %v132_v25 = vld [vmem:[%s383_s3] sm:$0xff]  ;;  %s261_s3 = smov [#allocation3]  }
   0xd   :  { %208 = vmatpush.msra.mxu3 %v145_v12  ;;  %v130_v61 = vld [vmem:[#allocation2] sm:$0xff]  ;;  %s186_s10 = sshll.u32 %s261_s3, 4  ;;  %s187_s10 = int_to_ptr.vmem [resolvable:$true] %s186_s10 }
   0xe   :  { %151 = vmatpush.msra.mxu2 %v144_v13  ;;  %v131_v0 = vld [vmem:[#allocation2 + $0x8] sm:$0xff] }
   0xf   :  { %209 = vmatpush.msra.mxu3 %v144_v13 }
  0x10   :  { %152 = vmatpush.msra.mxu2 %v143_v14 }
  0x11   :  { %201 = vmatmul.msk.f32.gmra.mxu0 %vm22_vm0, %v26_v9  ;;  %210 = vmatpush.msra.mxu3 %v143_v14 }
  0x12   :  { %203 = vmatmul.msk.f32.gmra.mxu1 %vm22_vm0, %v26_v9  ;;  %153 = vmatpush.msra.mxu2 %v142_v15 }
  0x13   :  { %211 = vmatpush.msra.mxu3 %v142_v15 }
  0x14   :  { %154 = vmatpush.msra.mxu2 %v141_v16 }
  0x15   :  { %212 = vmatpush.msra.mxu3 %v141_v16 }
  0x16   :  { %155 = vmatpush.msra.mxu2 %v140_v17 }
  0x17   :  { %213 = vmatpush.msra.mxu3 %v140_v17 }
  0x18   :  { %156 = vmatpush.msra.mxu2 %v139_v18 }
  0x19   :  { %214 = vmatpush.msra.mxu3 %v139_v18 }
  0x1a   :  { %157 = vmatpush.msra.mxu2 %v138_v19 }
  0x1b   :  { %215 = vmatpush.msra.mxu3 %v138_v19 }
  0x1c   :  { %158 = vmatpush.msra.mxu2 %v137_v20 }
  0x1d   :  { %216 = vmatpush.msra.mxu3 %v137_v20 }
  0x1e   :  { %159 = vmatpush.msra.mxu2 %v136_v21 }
  0x1f   :  { %217 = vmatpush.msra.mxu3 %v136_v21 }
  0x20   :  { %160 = vmatpush.msra.mxu2 %v135_v22 }
  0x21   :  { %218 = vmatpush.msra.mxu3 %v135_v22 }
  0x22   :  { %161 = vmatpush.msra.mxu2 %v134_v23 }
  0x23   :  { %219 = vmatpush.msra.mxu3 %v134_v23 }
  0x24   :  { %162 = vmatpush.msra.mxu2 %v133_v24 }
  0x25   :  { %220 = vmatpush.msra.mxu3 %v133_v24 }
  0x26   :  { %163 = vmatpush.msra.mxu2 %v132_v25 }
  0x27   :  { %221 = vmatpush.msra.mxu3 %v132_v25 }
  0x86   :  { %v55_v26 = vpop.f32.mrf.mxu0 }
  0x87   :  { %v204_v27 = vmul.f32 -1.442695, %v55_v26  ;;  %v82_v44 = vpop.f32.mrf.mxu1 }
  0x89   :  { %226 = vpow2.f32 %v204_v27 }
  0x8e   :  { %v58_v28 = vpop.f32.mrf.mxu0 }
  0x8f   :  { %v227_v29 = vpop.eup %226  ;;  %v205_v30 = vmul.f32 -1.442695, %v58_v28  ;;  %v85_v58 = vpop.f32.mrf.mxu1 }
  0x90   :  { %v94_v31 = vadd.f32 1.0, %v227_v29 }
  0x91   :  { %228 = vpow2.f32 %v205_v30 }
  0x92   :  { %230 = vrcp.f32 %v94_v31  ;;  %v107_v38 = vand.u32 2147483648, %v94_v31  ;;  %v105_v40 = vand.u32 2147483647, %v94_v31  ;;  %vm101_vm2 = vweird.f32 %v94_v31 }
  0x94   :  { %v108_v43 = vor.u32 1.1754944e-38, %v107_v38  ;;  %vm106_vm4 = vcmp.eq.f32.partialorder %v105_v40, 8.507059e+37 }
  0x97   :  { %v229_v33 = vpop.eup %228 }
  0x98   :  { %v231_v34 = vpop.eup %230  ;;  %v95_v35 = vadd.f32 1.0, %v229_v33 }
  0x99   :  { %v97_v36 = vmul.f32 %v231_v34, %v94_v31  ;;  %vm102_vm1 = vweird.f32 %v231_v34 }
  0x9a   :  { %232 = vrcp.f32 %v95_v35  ;;  %vm103_vm3 = vmor %vm101_vm2, %vm102_vm1  ;;  %v122_v50 = vand.u32 2147483648, %v95_v35  ;;  %v120_v52 = vand.u32 2147483647, %v95_v35  ;;  %vm116_vm6 = vweird.f32 %v95_v35 }
  0x9b   :  { %v98_v37 = vsub.f32 1.0, %v97_v36 }
  0x9c   :  { %v123_v55 = vor.u32 1.1754944e-38, %v122_v50  ;;  %vm121_vm8 = vcmp.eq.f32.partialorder %v120_v52, 8.507059e+37 }
  0x9d   :  { %v99_v39 = vmul.f32 %v231_v34, %v98_v37 }
  0x9f   :  { %v100_v41 = vadd.f32 %v231_v34, %v99_v39 }
  0xa0   :  { %v233_v42 = vpop.eup %232 }
  0xa1   :  { %v104_v45 = vsel %vm103_vm3, %v231_v34, %v100_v41  ;;  %v112_v46 = vmul.f32 %v233_v42, %v95_v35  ;;  %vm117_vm5 = vweird.f32 %v233_v42 }
  0xa2   :  { %v109_v47 = vsel %vm106_vm4, %v108_v43, %v104_v45  ;;  %vm118_vm7 = vmor %vm116_vm6, %vm117_vm5 }
  0xa3   :  { %v126_v48 = vmul.f32 %v109_v47, %v55_v26  ;;  %v113_v49 = vsub.f32 1.0, %v112_v46 }
  0xa5   :  { %v114_v51 = vmul.f32 %v233_v42, %v113_v49  ;;  %v128_v53 = vmul.f32 %v126_v48, %v82_v44 }
  0xa7   :  { %v115_v54 = vadd.f32 %v233_v42, %v114_v51  ;;  %164 = vmatmul.f32.vlgmr.msra.gmra.mxu2 %v128_v53 }
  0xa9   :  { %v119_v56 = vsel %vm118_vm7, %v233_v42, %v115_v54 }
  0xaa   :  { %v124_v57 = vsel %vm121_vm8, %v123_v55, %v119_v56 }
  0xab   :  { %v127_v59 = vmul.f32 %v124_v57, %v58_v28 }
  0xad   :  { %v129_v60 = vmul.f32 %v127_v59, %v85_v58 }
  0xaf   :  { %167 = vmatmul.f32.vlgmr.msra.gmra.mxu3 %v129_v60 }
 0x12a   :  { %v165_v62 = vpop.f32.mrf.mxu2 }
 0x12b   :  { %v171_v63 = vadd.f32 %v165_v62, %v130_v61 }
 0x12d   :  { %173 = vst.msk [vmem:[#allocation2] sm:$0xff] %vm22_vm0, %v171_v63 }
 0x132   :  { %v168_v1 = vpop.f32.mrf.mxu3 }
 0x133   :  { %v172_v2 = vadd.f32 %v168_v1, %v131_v0 }
 0x134   :  { %v178_v3 = vld [vmem:[#allocation2] sm:$0xff] }
 0x135   :  { %174 = vst.msk [vmem:[#allocation2 + $0x8] sm:$0xff] %vm22_vm0, %v172_v2 }
 0x136   :  { %180 = vst.msk [vmem:[#allocation3] sm:$0xff] %vm22_vm0, %v178_v3 }
 0x13c   :  { %v179_v4 = vld [vmem:[#allocation2 + $0x8] sm:$0xff] }
 0x13d   :  { %181 = vst.msk [vmem:[#allocation3 + $0x8] sm:$0xff] %vm22_vm0, %v179_v4 }
 0x13e   :  { %194 = dma.vmem_to_hbm [thread:$0]  %s187_s10, 256, %s189_s0, [#allocation4], %s262_s13, %s262_s13, %s263_s14  }
 0x13f   :  { %258 = dma.done.wait [#allocation4], 256  }
 0x140   :  { %259 = vsyncadd [#allocation4], 4294967040 }
 0x141   :  { %199 = vsyncpa [#allocation4], 1 }

</bundles_post_ra>
